<compile_context>
chip_gen: v7x
topology: tpu7x:2x2x1
jax: 0.10.0
libtpu: 0.0.40
codegen_flags: <defaults>
</compile_context>

<pallas_src>
import functools

import jax
import jax.numpy as jnp
from jax.experimental import pallas as pl
from jax.experimental.pallas import tpu as pltpu


def _round_up(n, m):
    return ((n + m - 1) // m) * m


# ---------------------------------------------------------------------------
# Kernel: one batch tile -> action_mean tile (only the real action_dim cols)
# ---------------------------------------------------------------------------
def _policy_mean_kernel(x_ref, w0_ref, b0_ref, w1_ref, b1_ref, wm_ref, bm_ref,
                        mean_ref):
    w_dtype = w0_ref.dtype  # MXU operand dtype (fp32 or bf16)

    # x stays fp32 in HBM; cast to the operand dtype in-kernel (hidden under
    # DMA/MXU) instead of a separate XLA convert pass over HBM.
    x = x_ref[...].astype(w_dtype)

    # Hidden layer 0: tanh(x @ W0 + b0), fp32 accumulation.
    h = jnp.dot(x, w0_ref[...], preferred_element_type=jnp.float32)
    h = jnp.tanh(h + b0_ref[...])
    # TODO(synk): on v6e/v7x the tanh could run in bf16 on the EUP (~2x that
    # slot); kept fp32 here for v5e portability and fp32-path exactness.

    # Hidden layer 1: tanh(h @ W1 + b1).
    h = jnp.dot(h.astype(w_dtype), w1_ref[...],
                preferred_element_type=jnp.float32)
    h = jnp.tanh(h + b1_ref[...])

    # action_mean linear on the 128-padded Wm/bm; store only the real columns.
    mean = jnp.dot(h.astype(w_dtype), wm_ref[...],
                   preferred_element_type=jnp.float32) + bm_ref[...]
    adim = mean_ref.shape[1]
    mean_ref[...] = mean[:, :adim].astype(mean_ref.dtype)


# ---------------------------------------------------------------------------
# Parameter preparation: pad lane dims to 128, optionally cast to bf16.
# ---------------------------------------------------------------------------
def prepare_policy_params(params, compute_dtype=jnp.float32):
    """Pad hidden / action dims to multiples of 128 and cast MXU operands.

    Zero padding preserves the math exactly: padded hidden units are
    tanh(0 + 0) = 0 and padded weight rows are zero, so they contribute
    nothing; padded output columns are never stored by the kernel.
    """
    state_dim, h0 = params["W0"].shape
    h1 = params["W1"].shape[1]
    action_dim = params["Wm"].shape[1]
    h0p = _round_up(h0, 128)
    h1p = _round_up(h1, 128)
    adp = _round_up(action_dim, 128)

    def pad2(a, rows, cols):
        return jnp.pad(a, ((0, rows - a.shape[0]), (0, cols - a.shape[1])))

    return {
        "W0": pad2(params["W0"], state_dim, h0p).astype(compute_dtype),
        "b0": pad2(params["b0"].reshape(1, -1), 1, h0p).astype(jnp.float32),
        "W1": pad2(params["W1"], h0p, h1p).astype(compute_dtype),
        "b1": pad2(params["b1"].reshape(1, -1), 1, h1p).astype(jnp.float32),
        "Wm": pad2(params["Wm"], h1p, adp).astype(compute_dtype),
        "bm": pad2(params["bm"].reshape(1, -1), 1, adp).astype(jnp.float32),
        "log_std": params["log_std"].reshape(1, -1).astype(jnp.float32),
        "state_dim": state_dim,
        "action_dim": action_dim,
    }


# ---------------------------------------------------------------------------
# Forward wrapper
# ---------------------------------------------------------------------------
def policy_forward(x, prep, *, block_b=4096):
    """Policy forward pass. Returns (action_mean, action_log_std, action_std).

    x: (B, state_dim) float32 (kept fp32 in HBM even on the bf16 path).
    prep: output of prepare_policy_params.
    block_b: max batch rows per grid step (multiple of 8; ~0.5 MiB/step of
             VMEM at the default, far inside every generation's scoped limit).
    """
    B, state_dim = x.shape
    assert state_dim == prep["state_dim"]
    action_dim = prep["action_dim"]

    W0, b0 = prep["W0"], prep["b0"]
    W1, b1 = prep["W1"], prep["b1"]
    Wm, bm = prep["Wm"], prep["bm"]
    h0p, h1p, adp = W0.shape[1], W1.shape[1], Wm.shape[1]

    block_b = max(8, _round_up(block_b, 8))
    if B <= block_b and B <= 2048:
        # Small batch: one grid step covering the whole batch. Block dim equal
        # to the full array dim is always legal -> no padding, no row slicing,
        # and no per-step overhead multiplication.
        tb = B
    else:
        # Large batch: tile spans >= 2 grid steps so v7x's two TensorCores
        # both get work ("parallel" batch axis). Ragged trailing block is
        # handled by Pallas: OOB input rows only feed masked-out output rows
        # of this row-independent MLP; OOB output rows are discarded.
        tb = min(block_b, _round_up(pl.cdiv(B, 2), 8))
    grid = (pl.cdiv(B, tb),)

    # Explicit BlockSpecs (no shared loop variable -> no late-binding issues).
    # x / mean are tiled along the batch; weights/biases use constant index
    # maps so they stay VMEM-resident across grid steps.
    in_specs = [
        pl.BlockSpec((tb, state_dim), lambda i: (i, 0)),   # x tile (pipelined)
        pl.BlockSpec(W0.shape, lambda i: (0, 0)),          # W0 resident
        pl.BlockSpec(b0.shape, lambda i: (0, 0)),          # b0 resident
        pl.BlockSpec(W1.shape, lambda i: (0, 0)),          # W1 resident
        pl.BlockSpec(b1.shape, lambda i: (0, 0)),          # b1 resident
        pl.BlockSpec(Wm.shape, lambda i: (0, 0)),          # Wm resident
        pl.BlockSpec(bm.shape, lambda i: (0, 0)),          # bm resident
    ]
    # Store only the real action_dim columns (16x less HBM write traffic than
    # the padded 128-wide slab; vst count per 8 rows is unchanged).
    out_specs = pl.BlockSpec((tb, action_dim), lambda i: (i, 0))

    flops = 2 * B * (state_dim * h0p + h0p * h1p + h1p * adp)
    transcendentals = B * (h0p + h1p)
    bytes_accessed = (
        x.size * x.dtype.itemsize
        + sum(a.size * a.dtype.itemsize for a in (W0, b0, W1, b1, Wm, bm))
        + B * action_dim * 4)

    action_mean = pl.pallas_call(
        _policy_mean_kernel,
        out_shape=jax.ShapeDtypeStruct((B, action_dim), jnp.float32),
        grid=grid,
        in_specs=in_specs,
        out_specs=out_specs,
        compiler_params=pltpu.CompilerParams(
            dimension_semantics=("parallel",)),   # batch axis -> megacore
        cost_estimate=pl.CostEstimate(flops=flops,
                                      transcendentals=transcendentals,
                                      bytes_accessed=bytes_accessed),
    )(x, W0, b0, W1, b1, Wm, bm)

    # log_std / std are batch-constant: compute once, broadcast in the wrapper
    # (no per-row HBM writes from the kernel).
    log_std_row = prep["log_std"][:, :action_dim]
    std_row = jnp.exp(log_std_row)
    action_log_std = jnp.broadcast_to(log_std_row, action_mean.shape)
    action_std = jnp.broadcast_to(std_row, action_mean.shape)
    return action_mean, action_log_std, action_std


# ---------------------------------------------------------------------------
# Init + pure-JAX reference (mirrors the PyTorch module defaults)
# ---------------------------------------------------------------------------
def init_policy_params(key, state_dim, action_dim, hidden_size=(128, 128),
                       log_std=0.0):
    """nn.Linear-style init (uniform +/-1/sqrt(fan_in)); action_mean weight
    scaled by 0.1, bias zeroed; log_std parameter = log_std."""
    keys = jax.random.split(key, 6)

    def linear_init(kw, kb, fan_in, fan_out):
        bound = 1.0 / jnp.sqrt(fan_in)
        W = jax.random.uniform(kw, (fan_in, fan_out), jnp.float32, -bound, bound)
        b = jax.random.uniform(kb, (fan_out,), jnp.float32, -bound, bound)
        return W, b

    h0, h1 = hidden_size
    W0, b0 = linear_init(keys[0], keys[1], state_dim, h0)
    W1, b1 = linear_init(keys[2], keys[3], h0, h1)
    Wm, bm = linear_init(keys[4], keys[5], h1, action_dim)
    Wm = Wm * 0.1
    bm = bm * 0.0
    return {
        "W0": W0, "b0": b0,
        "W1": W1, "b1": b1,
        "Wm": Wm, "bm": bm,
        "log_std": jnp.full((1, action_dim), log_std, jnp.float32),
    }


def policy_forward_ref(x, params):
    h = jnp.tanh(x @ params["W0"] + params["b0"])
    h = jnp.tanh(h @ params["W1"] + params["b1"])
    mean = h @ params["Wm"] + params["bm"]
    log_std = jnp.broadcast_to(params["log_std"], mean.shape)
    return mean, log_std, jnp.exp(log_std)


if __name__ == "__main__":
    key = jax.random.PRNGKey(0)
    k_param, k_x, k_x2 = jax.random.split(key, 3)

    batch = 19          # not a multiple of 8 -> exercises block == full batch
    state_dim = 16
    action_dim = 8
    hidden_size = (32, 32)

    params = init_policy_params(k_param, state_dim, action_dim, hidden_size,
                                log_std=0.0)
    x = jax.random.normal(k_x, (batch, state_dim), jnp.float32)

    # --- fp32 MXU path, single grid step ---
    prep_f32 = prepare_policy_params(params, compute_dtype=jnp.float32)
    mean, log_std, std = policy_forward(x, prep_f32)
    jax.block_until_ready((mean, log_std, std))

    mean_r, log_std_r, std_r = policy_forward_ref(x, params)
    assert mean.shape == (batch, action_dim)
    assert jnp.allclose(mean, mean_r, atol=1e-4, rtol=1e-4)
    assert jnp.allclose(log_std, log_std_r, atol=1e-6)
    assert jnp.allclose(std, std_r, atol=1e-6)

    # --- bf16 MXU-operand path (v6e/v7x fast path), fp32 accumulation ---
    prep_bf16 = prepare_policy_params(params, compute_dtype=jnp.bfloat16)
    mean_b, log_std_b, std_b = policy_forward(x, prep_bf16)
    jax.block_until_ready((mean_b, log_std_b, std_b))
    assert jnp.allclose(mean_b, mean_r, atol=5e-2, rtol=5e-2)
    assert jnp.allclose(std_b, std_r, atol=1e-6)

    # --- ragged multi-step grid: B=300, tile=128 -> 3 steps, partial last ---
    x2 = jax.random.normal(k_x2, (300, state_dim), jnp.float32)
    fwd_small_tile = functools.partial(policy_forward, block_b=128)
    mean2, _, _ = fwd_small_tile(x2, prep_f32)
    jax.block_until_ready(mean2)
    mean2_r, _, _ = policy_forward_ref(x2, params)
    assert mean2.shape == (300, action_dim)
    assert jnp.allclose(mean2, mean2_r, atol=1e-4, rtol=1e-4)

    print("KERNEL_OK")
</pallas_src>

<mosaic_0001>
module attributes {stable_mosaic.version = 11 : i64} {
  func.func @_policy_mean_kernel(%arg0: i32, %arg1: memref<19x16xf32, #tpu.memory_space<vmem>>, %arg2: memref<16x128xf32, #tpu.memory_space<vmem>>, %arg3: memref<1x128xf32, #tpu.memory_space<vmem>>, %arg4: memref<128x128xf32, #tpu.memory_space<vmem>>, %arg5: memref<1x128xf32, #tpu.memory_space<vmem>>, %arg6: memref<128x128xf32, #tpu.memory_space<vmem>>, %arg7: memref<1x128xf32, #tpu.memory_space<vmem>>, %arg8: memref<19x8xf32, #tpu.memory_space<vmem>>) attributes {dimension_semantics = [#tpu.dimension_semantics<parallel>], iteration_bounds = array<i64: 1>, scalar_prefetch = 0 : i64, scratch_operands = 0 : i64, tpu.core_type = #tpu.core_type<tc>, window_params = [{transform_indices = @transform_0, window_bounds = array<i64: 19, 16>}, {pipeline_mode = #tpu.pipeline_mode<synchronous>, transform_indices = @transform_1, window_bounds = array<i64: 16, 128>}, {pipeline_mode = #tpu.pipeline_mode<synchronous>, transform_indices = @transform_2, window_bounds = array<i64: 1, 128>}, {pipeline_mode = #tpu.pipeline_mode<synchronous>, transform_indices = @transform_3, window_bounds = array<i64: 128, 128>}, {pipeline_mode = #tpu.pipeline_mode<synchronous>, transform_indices = @transform_4, window_bounds = array<i64: 1, 128>}, {pipeline_mode = #tpu.pipeline_mode<synchronous>, transform_indices = @transform_5, window_bounds = array<i64: 128, 128>}, {pipeline_mode = #tpu.pipeline_mode<synchronous>, transform_indices = @transform_6, window_bounds = array<i64: 1, 128>}, {transform_indices = @transform_7, window_bounds = array<i64: 19, 8>}]} {
    %c0 = arith.constant 0 : index
    %c0_0 = arith.constant 0 : index
    %0 = vector.load %arg1[%c0, %c0_0] : memref<19x16xf32, #tpu.memory_space<vmem>>, vector<19x16xf32>
    %c0_1 = arith.constant 0 : index
    %c0_2 = arith.constant 0 : index
    %1 = vector.load %arg2[%c0_1, %c0_2] : memref<16x128xf32, #tpu.memory_space<vmem>>, vector<16x128xf32>
    %cst = arith.constant dense<0.000000e+00> : vector<19x128xf32>
    %2 = tpu.matmul %0, %1, %cst {dimension_numbers = #tpu.dot_dimension_numbers<[1], [0], [0], [1], [0, 0, 1, 1], [], []>} : vector<19x16xf32>, vector<16x128xf32>, vector<19x128xf32> -> vector<19x128xf32>
    %c0_3 = arith.constant 0 : index
    %c0_4 = arith.constant 0 : index
    %3 = vector.load %arg3[%c0_3, %c0_4] : memref<1x128xf32, #tpu.memory_space<vmem>>, vector<1x128xf32>
    %4 = vector.broadcast %3 : vector<1x128xf32> to vector<19x128xf32>
    %5 = arith.addf %2, %4 : vector<19x128xf32>
    %6 = math.tanh %5 : vector<19x128xf32>
    %c0_5 = arith.constant 0 : index
    %c0_6 = arith.constant 0 : index
    %7 = vector.load %arg4[%c0_5, %c0_6] : memref<128x128xf32, #tpu.memory_space<vmem>>, vector<128x128xf32>
    %cst_7 = arith.constant dense<0.000000e+00> : vector<19x128xf32>
    %8 = tpu.matmul %6, %7, %cst_7 {dimension_numbers = #tpu.dot_dimension_numbers<[1], [0], [0], [1], [0, 0, 1, 1], [], []>} : vector<19x128xf32>, vector<128x128xf32>, vector<19x128xf32> -> vector<19x128xf32>
    %c0_8 = arith.constant 0 : index
    %c0_9 = arith.constant 0 : index
    %9 = vector.load %arg5[%c0_8, %c0_9] : memref<1x128xf32, #tpu.memory_space<vmem>>, vector<1x128xf32>
    %10 = vector.broadcast %9 : vector<1x128xf32> to vector<19x128xf32>
    %11 = arith.addf %8, %10 : vector<19x128xf32>
    %12 = math.tanh %11 : vector<19x128xf32>
    %c0_10 = arith.constant 0 : index
    %c0_11 = arith.constant 0 : index
    %13 = vector.load %arg6[%c0_10, %c0_11] : memref<128x128xf32, #tpu.memory_space<vmem>>, vector<128x128xf32>
    %cst_12 = arith.constant dense<0.000000e+00> : vector<19x128xf32>
    %14 = tpu.matmul %12, %13, %cst_12 {dimension_numbers = #tpu.dot_dimension_numbers<[1], [0], [0], [1], [0, 0, 1, 1], [], []>} : vector<19x128xf32>, vector<128x128xf32>, vector<19x128xf32> -> vector<19x128xf32>
    %c0_13 = arith.constant 0 : index
    %c0_14 = arith.constant 0 : index
    %15 = vector.load %arg7[%c0_13, %c0_14] : memref<1x128xf32, #tpu.memory_space<vmem>>, vector<1x128xf32>
    %16 = vector.broadcast %15 : vector<1x128xf32> to vector<19x128xf32>
    %17 = arith.addf %14, %16 : vector<19x128xf32>
    %18 = vector.extract_strided_slice %17 {offsets = [0, 0], sizes = [19, 8], strides = [1, 1]} : vector<19x128xf32> to vector<19x8xf32>
    %c0_15 = arith.constant 0 : index
    %c0_16 = arith.constant 0 : index
    %19 = vector.load %arg8[%c0_15, %c0_16] : memref<19x8xf32, #tpu.memory_space<vmem>>, vector<19x8xf32>
    tpu.vector_store %arg8[%c0_15, %c0_16], %18 {strides = array<i32>} : memref<19x8xf32, #tpu.memory_space<vmem>>, vector<19x8xf32>,
    return
  }
  func.func @transform_0(%arg0: i32) -> (i32, i32) {
    %c0_i32 = arith.constant 0 : i32
    %c0_i32_0 = arith.constant 0 : i32
    return %arg0, %c0_i32 : i32, i32
  }
  func.func @transform_1(%arg0: i32) -> (i32, i32) {
    %c0_i32 = arith.constant 0 : i32
    %c0_i32_0 = arith.constant 0 : i32
    %c0_i32_1 = arith.constant 0 : i32
    return %c0_i32, %c0_i32_0 : i32, i32
  }
  func.func @transform_2(%arg0: i32) -> (i32, i32) {
    %c0_i32 = arith.constant 0 : i32
    %c0_i32_0 = arith.constant 0 : i32
    %c0_i32_1 = arith.constant 0 : i32
    return %c0_i32, %c0_i32_0 : i32, i32
  }
  func.func @transform_3(%arg0: i32) -> (i32, i32) {
    %c0_i32 = arith.constant 0 : i32
    %c0_i32_0 = arith.constant 0 : i32
    %c0_i32_1 = arith.constant 0 : i32
    return %c0_i32, %c0_i32_0 : i32, i32
  }
  func.func @transform_4(%arg0: i32) -> (i32, i32) {
    %c0_i32 = arith.constant 0 : i32
    %c0_i32_0 = arith.constant 0 : i32
    %c0_i32_1 = arith.constant 0 : i32
    return %c0_i32, %c0_i32_0 : i32, i32
  }
  func.func @transform_5(%arg0: i32) -> (i32, i32) {
    %c0_i32 = arith.constant 0 : i32
    %c0_i32_0 = arith.constant 0 : i32
    %c0_i32_1 = arith.constant 0 : i32
    return %c0_i32, %c0_i32_0 : i32, i32
  }
  func.func @transform_6(%arg0: i32) -> (i32, i32) {
    %c0_i32 = arith.constant 0 : i32
    %c0_i32_0 = arith.constant 0 : i32
    %c0_i32_1 = arith.constant 0 : i32
    return %c0_i32, %c0_i32_0 : i32, i32
  }
  func.func @transform_7(%arg0: i32) -> (i32, i32) {
    %c0_i32 = arith.constant 0 : i32
    %c0_i32_0 = arith.constant 0 : i32
    return %arg0, %c0_i32 : i32, i32
  }
}

</mosaic_0001>

<bundles_post_ra>
// kernel: tpu_custom_call.1
= control target key start
LH: loop header
LB: loop body
LE: loop exit
PB: predicated region body
PF: predicated region fallthrough
CT: control target
= control target key end

     0   :  { %12 = vsyncpa [#allocation3], 0  ;;  %s783_s0 = inlined_call_operand.vmem [shape: f32[19,16], index: 0, kind: input, shape index: {}]   ;;  %s784_s1 = inlined_call_operand.vmem [shape: f32[16,128], index: 1, kind: input, shape index: {}]   ;;  %s785_s2 = inlined_call_operand.vmem [shape: f32[1,128], index: 2, kind: input, shape index: {}]   ;;  %s786_s3 = inlined_call_operand.hbm [shape: f32[128,128], index: 3, kind: input, shape index: {}]   ;;  %s787_s4 = inlined_call_operand.vmem [shape: f32[1,128], index: 4, kind: input, shape index: {}]   ;;  %s788_s5 = inlined_call_operand.hbm [shape: f32[128,128], index: 5, kind: input, shape index: {}]   ;;  %s789_s6 = inlined_call_operand.vmem [shape: f32[1,128], index: 6, kind: input, shape index: {}]   ;;  %s790_s7 = inlined_call_operand.vmem [shape: f32[19,8], index: 7, kind: output, shape index: {}]  }
   0x1   :  { %13 = vsyncpa [#allocation5], 0  ;;  %s641_s24 = smov [#allocation2]   ;;  %s593_s28 = scalar_lea.hbm %s786_s3, 2048 }
   0x2   :  { %s25_s25 = sshll.u32 %s641_s24, 4  ;;  %p594_p0 = scmp.ne.s32.totalorder %s786_s3, %s593_s28  ;;  %s26_s25 = int_to_ptr.vmem [resolvable:$true] %s25_s25 }
   0x3   :  { %p597_p1 = scmp.lt.u32.totalorder %s593_s28, %s786_s3 }
   0x5   :  { %p599_p2 = pnand %p597_p1, %p594_p0 }
   0x7   :  { %602 = shalt.err (!%p599_p2)
}
   0x8   :  { %s603_s10 = scalar_lea.vmem %s26_s25, 2048  ;;  %p608_p4 = scmp.lt.s32.totalorder %s26_s25, %s26_s25 }
   0x9   :  { %p604_p3 = scmp.ne.s32.totalorder %s26_s25, %s603_s10  ;;  %p609_p5 = scmp.lt.s32.totalorder %s603_s10, %s603_s10 }
   0xb   :  { %p610_p6 = por %p609_p5, %p608_p4 }
   0xd   :  { %p611_p7 = pnand %p610_p6, %p604_p3 }
   0xf   :  { %614 = shalt.err (!%p611_p7)
}
  0x10   :  { %s642_s11 = smov 128   ;;  %s643_s12 = smov 8  }
  0x11   :  { %31 = dma.hbm_to_vmem [thread:$0]  %s786_s3, 2048, %s26_s25, [#allocation3], %s642_s11, %s642_s11, %s643_s12  }
  0x12   :  { %s644_s15 = smov [#allocation4]   ;;  %s615_s19 = scalar_lea.hbm %s788_s5, 2048 }
  0x13   :  { %s39_s16 = sshll.u32 %s644_s15, 4  ;;  %p616_p8 = scmp.ne.s32.totalorder %s788_s5, %s615_s19  ;;  %s40_s16 = int_to_ptr.vmem [resolvable:$true] %s39_s16 }
  0x14   :  { %p619_p9 = scmp.lt.u32.totalorder %s615_s19, %s788_s5 }
  0x16   :  { %p621_p10 = pnand %p619_p9, %p616_p8 }
  0x18   :  { %624 = shalt.err (!%p621_p10)
}
  0x19   :  { %s625_s24 = scalar_lea.vmem %s40_s16, 2048  ;;  %p630_p12 = scmp.lt.s32.totalorder %s40_s16, %s40_s16 }
  0x1a   :  { %p626_p11 = scmp.ne.s32.totalorder %s40_s16, %s625_s24  ;;  %p631_p13 = scmp.lt.s32.totalorder %s625_s24, %s625_s24 }
  0x1c   :  { %p632_p0 = por %p631_p13, %p630_p12 }
  0x1e   :  { %p633_p1 = pnand %p632_p0, %p626_p11 }
  0x20   :  { %636 = shalt.err (!%p633_p1)
}
  0x21   :  { %45 = dma.hbm_to_vmem [thread:$0]  %s788_s5, 2048, %s40_s16, [#allocation5], %s642_s11, %s642_s11, %s643_s12  }
  0x22   :  { %637 = dma.done.wait [#allocation3], 2048  }
  0x23   :  { %638 = vsyncadd [#allocation3], 4294965248 }
  0x24   :  { %639 = dma.done.wait [#allocation5], 2048  }
  0x25   :  { %640 = vsyncadd [#allocation5], 4294965248  ;;  %v645_v0 = vmov 0.0|0.0   ;;  %vm646_vm0 = vmmov 0   ;;  %v647_v1 = vmov 0.0   ;;  %v57_v2 = vld [vmem:[%s784_s1] sm:$0xff] }
  0x26   :  { %523 = vmatprep.subr.bf16.mxu0 %v645_v0  ;;  %432 = vmatprep.mubr.msk.f32.mxu0 %vm646_vm0, %v647_v1  ;;  %v58_v3 = vld [vmem:[%s784_s1 + $0x8] sm:$0xff]  ;;  %v159_v5 = vld [vmem:[#allocation2] sm:$0xff]  ;;  %v161_v7 = vld [vmem:[#allocation2 + $0x10] sm:$0xff]  ;;  %vm66_vm1 = vcmask 130048   ;;  %vm368_vm2 = vcmask 64512   ;;  %vm371_vm3 = vcmask 59392  }
  0x27   :  { %526 = vmatprep.subr.bf16.mxu1 %v645_v0  ;;  %473 = vmatprep.mubr.msk.f32.mxu1 %vm646_vm0, %v647_v1  ;;  %v524_v4 = vpack.c.bf16 %v58_v3, %v57_v2  ;;  %v160_v6 = vld [vmem:[#allocation2 + $0x8] sm:$0xff]  ;;  %v162_v8 = vld [vmem:[#allocation2 + $0x18] sm:$0xff]  ;;  %v54_v9 = vld [vmem:[%s783_s0] sm:$0xff] }
  0x28   :  { %v527_v10 = vpack.c.bf16 %v160_v6, %v159_v5  ;;  %v530_v11 = vpack.c.bf16 %v162_v8, %v161_v7  ;;  %v163_v12 = vld [vmem:[#allocation2 + $0x20] sm:$0xff]  ;;  %v164_v13 = vld [vmem:[#allocation2 + $0x28] sm:$0xff]  ;;  %v165_v16 = vld [vmem:[#allocation2 + $0x30] sm:$0xff] }
  0x29   :  { %525 = vmatpush3.bf16.msra.mxu0 %v524_v4  ;;  %v55_v14 = vld [vmem:[%s783_s0 + $0x8] sm:$0xff]  ;;  %v533_v15 = vpack.c.bf16 %v164_v13, %v163_v12  ;;  %v166_v17 = vld [vmem:[#allocation2 + $0x38] sm:$0xff]  ;;  %v56_v18 = vld [vmem:[%s783_s0 + $0x10] sm:$0x7] }
  0x2a   :  { %550 = vmatprep.subr.bf16.mxu0 %v645_v0  ;;  %528 = vmatpush3.bf16.msra.mxu1 %v527_v10  ;;  %v536_v19 = vpack.c.bf16 %v166_v17, %v165_v16  ;;  %v167_v20 = vld [vmem:[#allocation2 + $0x40] sm:$0xff]  ;;  %v168_v21 = vld [vmem:[#allocation2 + $0x48] sm:$0xff]  ;;  %v169_v23 = vld [vmem:[#allocation2 + $0x50] sm:$0xff] }
  0x2b   :  { %529 = vmatprep.subr.bf16.mxu1 %v645_v0  ;;  %v539_v22 = vpack.c.bf16 %v168_v21, %v167_v20  ;;  %v170_v24 = vld [vmem:[#allocation2 + $0x58] sm:$0xff]  ;;  %v171_v26 = vld [vmem:[#allocation2 + $0x60] sm:$0xff]  ;;  %v172_v27 = vld [vmem:[#allocation2 + $0x68] sm:$0xff] }
  0x2c   :  { %433 = vmatmul.mubr.msk.f32.vlgmr.msra.gmra.mrb[0].mxu0 %vm66_vm1, %v54_v9  ;;  %v542_v25 = vpack.c.bf16 %v170_v24, %v169_v23  ;;  %v545_v28 = vpack.c.bf16 %v172_v27, %v171_v26  ;;  %v173_v29 = vld [vmem:[#allocation2 + $0x70] sm:$0xff]  ;;  %v174_v30 = vld [vmem:[#allocation2 + $0x78] sm:$0xff]  ;;  %v265_v32 = vld [vmem:[#allocation4] sm:$0xff] }
  0x2d   :  { %435 = vmatprep.mubr.msk.f32.mxu0 %vm646_vm0, %v647_v1  ;;  %v548_v31 = vpack.c.bf16 %v174_v30, %v173_v29  ;;  %v266_v33 = vld [vmem:[#allocation4 + $0x8] sm:$0xff]  ;;  %v267_v34 = vld [vmem:[#allocation4 + $0x10] sm:$0xff]  ;;  %v268_v36 = vld [vmem:[#allocation4 + $0x18] sm:$0xff] }
  0x2e   :  { %531 = vmatpush3.bf16.msra.mxu1 %v530_v11  ;;  %v551_v35 = vpack.c.bf16 %v266_v33, %v265_v32  ;;  %v554_v37 = vpack.c.bf16 %v268_v36, %v267_v34  ;;  %v269_v38 = vld [vmem:[#allocation4 + $0x20] sm:$0xff]  ;;  %v270_v39 = vld [vmem:[#allocation4 + $0x28] sm:$0xff]  ;;  %v271_v41 = vld [vmem:[#allocation4 + $0x30] sm:$0xff] }
  0x2f   :  { %532 = vmatprep.subr.bf16.mxu1 %v645_v0  ;;  %v557_v40 = vpack.c.bf16 %v270_v39, %v269_v38  ;;  %v272_v42 = vld [vmem:[#allocation4 + $0x38] sm:$0xff]  ;;  %v273_v44 = vld [vmem:[#allocation4 + $0x40] sm:$0xff]  ;;  %v274_v45 = vld [vmem:[#allocation4 + $0x48] sm:$0xff] }
  0x30   :  { %436 = vmatmul.mubr.msk.f32.gmra.mrb[2].mxu0 %vm66_vm1, %v55_v14  ;;  %v560_v43 = vpack.c.bf16 %v272_v42, %v271_v41  ;;  %v563_v46 = vpack.c.bf16 %v274_v45, %v273_v44  ;;  %v379_v47 = vld [vmem:[%s785_s2] ss:$0 sm:$0xff]  ;;  %v275_v60 = vld [vmem:[#allocation4 + $0x50] sm:$0xff]  ;;  %v276_v61 = vld [vmem:[#allocation4 + $0x58] sm:$0xff] }
  0x31   :  { %438 = vmatprep.mubr.msk.f32.mxu0 %vm646_vm0, %v647_v1  ;;  %552 = vmatpush3.bf16.msra.mxu0 %v551_v35  ;;  %v566_v62 = vpack.c.bf16 %v276_v61, %v275_v60  ;;  %v277_v63 = vld [vmem:[#allocation4 + $0x60] sm:$0xff]  ;;  %v278_v2 = vld [vmem:[#allocation4 + $0x68] sm:$0xff]  ;;  %v279_v4 = vld [vmem:[#allocation4 + $0x70] sm:$0xff] }
  0x32   :  { %534 = vmatpush3.bf16.msra.mxu1 %v533_v15  ;;  %553 = vmatprep.subr.bf16.mxu0 %v645_v0  ;;  %v569_v3 = vpack.c.bf16 %v278_v2, %v277_v63  ;;  %v280_v5 = vld [vmem:[#allocation4 + $0x78] sm:$0xff]  ;;  %v383_v7 = vld [vmem:[%s787_s4] ss:$0 sm:$0xff] }
  0x33   :  { %535 = vmatprep.subr.bf16.mxu1 %v645_v0  ;;  %v572_v6 = vpack.c.bf16 %v280_v5, %v279_v4 }
  0x34   :  { %439 = vmatmul.mubr.msk.f32.gmra.mrb[4].mxu0 %vm66_vm1, %v56_v18 }
  0x35   :  { %514 = vmatprep.mubr.msk.f32.mxu0 %vm646_vm0, %v647_v1  ;;  %555 = vmatpush3.bf16.msra.mxu0 %v554_v37 }
  0x36   :  { %537 = vmatpush3.bf16.msra.mxu1 %v536_v19  ;;  %556 = vmatprep.subr.bf16.mxu0 %v645_v0  ;;  %v384_v19 = vld [vmem:[%s789_s6] ss:$0 sm:$0xff] }
  0x37   :  { %538 = vmatprep.subr.bf16.mxu1 %v645_v0 }
  0x39   :  { %558 = vmatpush3.bf16.msra.mxu0 %v557_v40 }
  0x3a   :  { %540 = vmatpush3.bf16.msra.mxu1 %v539_v22  ;;  %559 = vmatprep.subr.bf16.mxu0 %v645_v0 }
  0x3b   :  { %541 = vmatprep.subr.bf16.mxu1 %v645_v0 }
  0x3d   :  { %561 = vmatpush3.bf16.msra.mxu0 %v560_v43 }
  0x3e   :  { %543 = vmatpush3.bf16.msra.mxu1 %v542_v25  ;;  %562 = vmatprep.subr.bf16.mxu0 %v645_v0 }
  0x3f   :  { %544 = vmatprep.subr.bf16.mxu1 %v645_v0 }
  0x41   :  { %564 = vmatpush3.bf16.msra.mxu0 %v563_v46 }
  0x42   :  { %546 = vmatpush3.bf16.msra.mxu1 %v545_v28  ;;  %565 = vmatprep.subr.bf16.mxu0 %v645_v0 }
  0x43   :  { %547 = vmatprep.subr.bf16.mxu1 %v645_v0 }
  0x45   :  { %567 = vmatpush3.bf16.msra.mxu0 %v566_v62 }
  0x46   :  { %549 = vmatpush3.bf16.msra.mxu1 %v548_v31  ;;  %568 = vmatprep.subr.bf16.mxu0 %v645_v0 }
  0x49   :  { %570 = vmatpush3.bf16.msra.mxu0 %v569_v3 }
  0x4a   :  { %571 = vmatprep.subr.bf16.mxu0 %v645_v0 }
  0x4d   :  { %573 = vmatpush3.bf16.msra.mxu0 %v572_v6 }
  0xff   :  { %v142_v48 = vpop.f32.mrb[0].mxu0 }
 0x100   :  { %v143_v49 = vadd.f32 %v379_v47, %v142_v48  ;;  %v434_v50 = vpop.f32.mrb[1].mxu0 }
 0x102   :  { %581 = vtanh.f32 %v143_v49 }
 0x103   :  { %v147_v51 = vpop.f32.mrb[2].mxu0 }
 0x104   :  { %v148_v52 = vadd.f32 %v379_v47, %v147_v51  ;;  %v437_v53 = vpop.f32.mrb[3].mxu0 }
 0x106   :  { %583 = vtanh.f32 %v148_v52 }
 0x107   :  { %v152_v54 = vpop.f32.mrb[4].mxu0 }
 0x108   :  { %v153_v55 = vadd.f32 %v379_v47, %v152_v54  ;;  %v440_v56 = vpop.f32.mrb[5].mxu0 }
 0x10a   :  { %585 = vtanh.f32 %v153_v55 }
 0x10c   :  { %v582_v57 = vpop.eup %581 }
 0x10d   :  { %474 = vmatmul.mubr.f32.vlgmr.msra.gmra.mrb[0].mxu1 %v582_v57 }
 0x10e   :  { %476 = vmatprep.mubr.msk.f32.mxu1 %vm646_vm0, %v647_v1 }
 0x110   :  { %v584_v58 = vpop.eup %583 }
 0x111   :  { %477 = vmatmul.mubr.f32.gmra.mrb[2].mxu1 %v584_v58 }
 0x112   :  { %479 = vmatprep.mubr.msk.f32.mxu1 %vm646_vm0, %v647_v1 }
 0x114   :  { %v586_v59 = vpop.eup %585 }
 0x115   :  { %480 = vmatmul.mubr.f32.gmra.mrb[4].mxu1 %v586_v59 }
 0x1e0   :  { %v248_v8 = vpop.f32.mrb[0].mxu1 }
 0x1e1   :  { %v249_v9 = vadd.f32 %v383_v7, %v248_v8  ;;  %v475_v10 = vpop.f32.mrb[1].mxu1 }
 0x1e3   :  { %587 = vtanh.f32 %v249_v9 }
 0x1e4   :  { %v253_v11 = vpop.f32.mrb[2].mxu1 }
 0x1e5   :  { %v254_v12 = vadd.f32 %v383_v7, %v253_v11  ;;  %v478_v13 = vpop.f32.mrb[3].mxu1 }
 0x1e7   :  { %589 = vtanh.f32 %v254_v12 }
 0x1e8   :  { %v258_v14 = vpop.f32.mrb[4].mxu1 }
 0x1e9   :  { %v259_v15 = vadd.f32 %v383_v7, %v258_v14  ;;  %v481_v16 = vpop.f32.mrb[5].mxu1 }
 0x1eb   :  { %591 = vtanh.f32 %v259_v15 }
 0x1ed   :  { %v588_v0 = vpop.eup %587 }
 0x1ee   :  { %515 = vmatmul.mubr.f32.vlgmr.msra.gmra.mrb[6].mxu0 %v588_v0 }
 0x1ef   :  { %517 = vmatprep.mubr.msk.f32.mxu0 %vm646_vm0, %v647_v1 }
 0x1f1   :  { %v590_v17 = vpop.eup %589 }
 0x1f2   :  { %518 = vmatmul.mubr.f32.gmra.mrb[8].mxu0 %v590_v17 }
 0x1f3   :  { %520 = vmatprep.mubr.msk.f32.mxu0 %vm646_vm0, %v647_v1 }
 0x1f5   :  { %v592_v18 = vpop.eup %591 }
 0x1f6   :  { %521 = vmatmul.mubr.f32.gmra.mrb[10].mxu0 %v592_v18 }
 0x2c1   :  { %v354_v20 = vpop.f32.mrb[6].mxu0 }
 0x2c2   :  { %v355_v21 = vadd.f32 %v384_v19, %v354_v20  ;;  %v516_v22 = vpop.f32.mrb[7].mxu0 }
 0x2c4   :  { %369 = vst.msk [vmem:[%s790_s7] sm:$0xff] %vm368_vm2, %v355_v21 }
 0x2c5   :  { %v359_v23 = vpop.f32.mrb[8].mxu0 }
 0x2c6   :  { %v360_v24 = vadd.f32 %v384_v19, %v359_v23  ;;  %v519_v25 = vpop.f32.mrb[9].mxu0 }
 0x2c8   :  { %370 = vst.msk [vmem:[%s790_s7 + $0x8] sm:$0xff] %vm368_vm2, %v360_v24 }
 0x2c9   :  { %v364_v1 = vpop.f32.mrb[10].mxu0 }
 0x2ca   :  { %v365_v26 = vadd.f32 %v384_v19, %v364_v1  ;;  %v522_v27 = vpop.f32.mrb[11].mxu0 }
 0x2cc   :  { %372 = vst.msk [vmem:[%s790_s7 + $0x10] sm:$0x7] %vm371_vm3, %v365_v26 }
 0x2cd   :  { %377 = vsyncpa [#allocation3], 1 }
 0x2ce   :  { %378 = vsyncpa [#allocation5], 1 }

</bundles_post_ra>
